<compile_context>
chip_gen: v6e
topology: v6e:2x2x1
jax: 0.10.0
libtpu: 0.0.40
codegen_flags: <defaults>
</compile_context>

<pallas_src>
import functools

import numpy as np

import jax
import jax.numpy as jnp
from jax.experimental import pallas as pl
from jax.experimental.pallas import tpu as pltpu


def _round_up(n, m):
    return ((n + m - 1) // m) * m


def _patch_embed_kernel(x_ref, w_ref, b_ref, o_ref):
    # x_ref: (TN, K)     one tile of flattened patches (compute dtype)
    # w_ref: (K, E_pad)  conv weight, reshaped + transposed (resident)
    # b_ref: (1, E_pad)  conv bias, f32 (resident)
    # o_ref: (TN, E_pad)
    acc = jnp.dot(x_ref[...], w_ref[...], preferred_element_type=jnp.float32)
    o_ref[...] = (acc + b_ref[...]).astype(o_ref.dtype)


@functools.partial(
    jax.jit,
    static_argnames=("patch_size", "compute_dtype", "tile_n", "out_dtype",
                     "resident_buffers"))
def _patch_embed_impl(x, weight, bias, patch_size, compute_dtype, tile_n,
                      out_dtype, resident_buffers):
    B, C, H, W = x.shape
    E = weight.shape[0]
    P = patch_size
    assert H % P == 0 and W % P == 0, (H, W, P)
    nh, nw = H // P, W // P
    num_patches = nh * nw
    K = C * P * P
    N = B * num_patches

    cdt = np.dtype(compute_dtype)
    odt = x.dtype if out_dtype is None else np.dtype(out_dtype)

    # Cast first: the patchify transpose then moves compute-dtype (bf16) bytes
    # and fuses with the cast in a single XLA pass.
    xc = x.astype(cdt)
    patches = xc.reshape(B, C, nh, P, nw, P)
    patches = jnp.transpose(patches, (0, 2, 4, 1, 3, 5))   # (B, nh, nw, C, P, P)
    patches = patches.reshape(N, K)                         # row = (b, ph, pw)

    w2d = weight.astype(cdt).reshape(E, K).T                # (K, E)
    b2d = bias.astype(jnp.float32).reshape(1, E)            # bias add stays f32

    # Lane-dense embedding dim (no-op for typical ViT widths 768/1024/1280).
    E_pad = _round_up(E, 128)
    if E_pad != E:
        w2d = jnp.pad(w2d, ((0, 0), (0, E_pad - E)))
        b2d = jnp.pad(b2d, ((0, 0), (0, E_pad - E)))

    # ---- N-tile size from a VMEM budget -----------------------------------
    x_bytes = cdt.itemsize
    o_bytes = np.dtype(odt).itemsize
    resident_bytes = resident_buffers * (K * E_pad * x_bytes + E_pad * 4)
    per_row_bytes = 2 * (K * x_bytes + E_pad * o_bytes)   # double-buffered tiles
    budget = 32 * 1024 * 1024                              # safe on v5e/v6e/v7x
    tn_budget = max(8, ((budget - resident_bytes) // per_row_bytes) // 8 * 8)
    TN = min(_round_up(tile_n, 8), tn_budget, _round_up(N, 8))
    # Keep >= 2 grid steps when N allows it so the "parallel" N axis can shard
    # across both v7x TensorCores.
    TN = max(8, min(TN, _round_up(pl.cdiv(N, 2), 8)))
    grid = (pl.cdiv(N, TN),)

    vmem_need = resident_bytes + TN * per_row_bytes
    vmem_limit = int(min(64 * 1024 * 1024,
                         max(32 * 1024 * 1024, 2 * vmem_need)))

    resident_kwargs = (
        {"pipeline_mode": pl.Buffered(1)} if resident_buffers == 1 else {})

    cost = pl.CostEstimate(
        flops=2 * N * K * E_pad,
        transcendentals=0,
        bytes_accessed=(N * K * x_bytes + K * E_pad * x_bytes + E_pad * 4
                        + N * E_pad * o_bytes),
    )

    out = pl.pallas_call(
        _patch_embed_kernel,
        out_shape=jax.ShapeDtypeStruct((N, E_pad), odt),
        grid_spec=pltpu.PrefetchScalarGridSpec(
            num_scalar_prefetch=0,
            grid=grid,
            in_specs=[
                pl.BlockSpec((TN, K), lambda i: (i, 0)),             # streamed
                pl.BlockSpec((K, E_pad), lambda i: (0, 0), **resident_kwargs),
                pl.BlockSpec((1, E_pad), lambda i: (0, 0), **resident_kwargs),
            ],
            out_specs=pl.BlockSpec((TN, E_pad), lambda i: (i, 0)),
        ),
        compiler_params=pltpu.CompilerParams(
            dimension_semantics=("parallel",),       # N axis is independent
            vmem_limit_bytes=vmem_limit,
        ),
        cost_estimate=cost,
    )(patches, w2d, b2d)

    if E_pad != E:
        out = out[:, :E]
    return out.reshape(B, num_patches, E)


def patch_embed(x, weight, bias, patch_size, *, compute_dtype=jnp.bfloat16,
                tile_n=512, out_dtype=None):
    """ViT patch embedding.  x: (B, C, H, W); weight: (E, C, P, P); bias: (E,).

    Returns (B, num_patches, E) in `out_dtype` (default: x.dtype).
    `compute_dtype` feeds the MXU (bf16 default on all generations;
    accumulation is always f32).  `tile_n` caps the N tile: 512 is safe on
    v5e / v7x; raise to 1024 on v6e (128 MiB VMEM) when E <= 1024.
    """
    try:
        return _patch_embed_impl(x, weight, bias, patch_size, compute_dtype,
                                 tile_n, out_dtype, 1)
    except Exception:
        # pipeline_mode=pl.Buffered(1) (single-buffered resident weight/bias)
        # is not available on every JAX version; retry with the default
        # double-buffered resident blocks.
        return _patch_embed_impl(x, weight, bias, patch_size, compute_dtype,
                                 tile_n, out_dtype, 2)


def _reference(x, weight, bias, P):
    ref = jax.lax.conv_general_dilated(
        x, weight, window_strides=(P, P), padding="VALID",
        dimension_numbers=("NCHW", "OIHW", "NCHW"))
    ref = ref + bias[None, :, None, None]
    B, E = x.shape[0], weight.shape[0]
    return ref.reshape(B, E, -1).transpose(0, 2, 1)   # == flatten(2).transpose(1, 2)


if __name__ == "__main__":
    # Small shapes consistent with PatchEmbed: img_size=16, patch=4, C=4, E=32.
    B, C, H, W = 2, 4, 16, 16
    P = 4
    E = 32

    key = jax.random.PRNGKey(0)
    kx, kw, kb = jax.random.split(key, 3)

    x = jax.random.normal(kx, (B, C, H, W), dtype=jnp.float32)
    fan_in = C * P * P
    bound = 1.0 / float(np.sqrt(fan_in))
    weight = jax.random.uniform(kw, (E, C, P, P), jnp.float32, -bound, bound)
    bias = jax.random.uniform(kb, (E,), jnp.float32, -bound, bound)

    ref = _reference(x, weight, bias, P)

    # Default path: bf16 MXU inputs, f32 accumulation (bf16-rounding tolerance).
    out = patch_embed(x, weight, bias, P)
    jax.block_until_ready(out)
    assert out.shape == (B, (H // P) * (W // P), E), out.shape
    assert jnp.allclose(out, ref, atol=5e-2, rtol=5e-2), (
        float(jnp.max(jnp.abs(out - ref))))

    # f32 compute path.  Tolerance allows for the MXU's default f32 matmul
    # algorithm (possibly multi-pass bf16); a wrong kernel would be off by O(1).
    out_f32 = patch_embed(x, weight, bias, P, compute_dtype=jnp.float32)
    jax.block_until_ready(out_f32)
    assert jnp.allclose(out_f32, ref, atol=1e-2, rtol=1e-2), (
        float(jnp.max(jnp.abs(out_f32 - ref))))

    print("KERNEL_OK")
</pallas_src>

<mosaic_0001>
module attributes {stable_mosaic.version = 11 : i64} {
  func.func @_patch_embed_kernel(%arg0: i32, %arg1: memref<16x64xbf16, #tpu.memory_space<vmem>>, %arg2: memref<64x128xbf16, #tpu.memory_space<vmem>>, %arg3: memref<1x128xf32, #tpu.memory_space<vmem>>, %arg4: memref<16x128xf32, #tpu.memory_space<vmem>>) attributes {dimension_semantics = [#tpu.dimension_semantics<parallel>], iteration_bounds = array<i64: 2>, scalar_prefetch = 0 : i64, scratch_operands = 0 : i64, tpu.core_type = #tpu.core_type<tc>, window_params = [{transform_indices = @transform_0, window_bounds = array<i64: 16, 64>}, {pipeline_mode = #tpu.pipeline_mode<synchronous>, transform_indices = @transform_1, window_bounds = array<i64: 64, 128>}, {pipeline_mode = #tpu.pipeline_mode<synchronous>, transform_indices = @transform_2, window_bounds = array<i64: 1, 128>}, {transform_indices = @transform_3, window_bounds = array<i64: 16, 128>}]} {
    %c0 = arith.constant 0 : index
    %c0_0 = arith.constant 0 : index
    %0 = vector.load %arg1[%c0, %c0_0] : memref<16x64xbf16, #tpu.memory_space<vmem>>, vector<16x64xbf16>
    %c0_1 = arith.constant 0 : index
    %c0_2 = arith.constant 0 : index
    %1 = vector.load %arg2[%c0_1, %c0_2] : memref<64x128xbf16, #tpu.memory_space<vmem>>, vector<64x128xbf16>
    %cst = arith.constant dense<0.000000e+00> : vector<16x128xf32>
    %2 = tpu.matmul %0, %1, %cst {dimension_numbers = #tpu.dot_dimension_numbers<[1], [0], [0], [1], [0, 0, 1, 1], [], []>} : vector<16x64xbf16>, vector<64x128xbf16>, vector<16x128xf32> -> vector<16x128xf32>
    %c0_3 = arith.constant 0 : index
    %c0_4 = arith.constant 0 : index
    %3 = vector.load %arg3[%c0_3, %c0_4] : memref<1x128xf32, #tpu.memory_space<vmem>>, vector<1x128xf32>
    %4 = vector.broadcast %3 : vector<1x128xf32> to vector<16x128xf32>
    %5 = arith.addf %2, %4 : vector<16x128xf32>
    %c0_5 = arith.constant 0 : index
    %c0_6 = arith.constant 0 : index
    %6 = vector.load %arg4[%c0_5, %c0_6] : memref<16x128xf32, #tpu.memory_space<vmem>>, vector<16x128xf32>
    tpu.vector_store %arg4[%c0_5, %c0_6], %5 {strides = array<i32>} : memref<16x128xf32, #tpu.memory_space<vmem>>, vector<16x128xf32>,
    return
  }
  func.func @transform_0(%arg0: i32) -> (i32, i32) {
    %c0_i32 = arith.constant 0 : i32
    %c0_i32_0 = arith.constant 0 : i32
    return %arg0, %c0_i32 : i32, i32
  }
  func.func @transform_1(%arg0: i32) -> (i32, i32) {
    %c0_i32 = arith.constant 0 : i32
    %c0_i32_0 = arith.constant 0 : i32
    %c0_i32_1 = arith.constant 0 : i32
    return %c0_i32, %c0_i32_0 : i32, i32
  }
  func.func @transform_2(%arg0: i32) -> (i32, i32) {
    %c0_i32 = arith.constant 0 : i32
    %c0_i32_0 = arith.constant 0 : i32
    %c0_i32_1 = arith.constant 0 : i32
    return %c0_i32, %c0_i32_0 : i32, i32
  }
  func.func @transform_3(%arg0: i32) -> (i32, i32) {
    %c0_i32 = arith.constant 0 : i32
    %c0_i32_0 = arith.constant 0 : i32
    return %arg0, %c0_i32 : i32, i32
  }
}

module attributes {stable_mosaic.version = 11 : i64} {
  func.func @_patch_embed_kernel(%arg0: i32, %arg1: memref<16x64xbf16, #tpu.memory_space<vmem>>, %arg2: memref<64x128xbf16, #tpu.memory_space<vmem>>, %arg3: memref<1x128xf32, #tpu.memory_space<vmem>>, %arg4: memref<16x128xf32, #tpu.memory_space<vmem>>) attributes {dimension_semantics = [#tpu.dimension_semantics<parallel>], iteration_bounds = array<i64: 2>, scalar_prefetch = 0 : i64, scratch_operands = 0 : i64, tpu.core_type = #tpu.core_type<tc>, window_params = [{transform_indices = @transform_0, window_bounds = array<i64: 16, 64>}, {pipeline_mode = #tpu.pipeline_mode<synchronous>, transform_indices = @transform_1, window_bounds = array<i64: 64, 128>}, {pipeline_mode = #tpu.pipeline_mode<synchronous>, transform_indices = @transform_2, window_bounds = array<i64: 1, 128>}, {transform_indices = @transform_3, window_bounds = array<i64: 16, 128>}]} {
    %c0 = arith.constant 0 : index
    %c0_0 = arith.constant 0 : index
    %0 = vector.load %arg1[%c0, %c0_0] : memref<16x64xbf16, #tpu.memory_space<vmem>>, vector<16x64xbf16>
    %c0_1 = arith.constant 0 : index
    %c0_2 = arith.constant 0 : index
    %1 = vector.load %arg2[%c0_1, %c0_2] : memref<64x128xbf16, #tpu.memory_space<vmem>>, vector<64x128xbf16>
    %cst = arith.constant dense<0.000000e+00> : vector<16x128xf32>
    %2 = tpu.matmul %0, %1, %cst {dimension_numbers = #tpu.dot_dimension_numbers<[1], [0], [0], [1], [0, 0, 1, 1], [], []>} : vector<16x64xbf16>, vector<64x128xbf16>, vector<16x128xf32> -> vector<16x128xf32>
    %c0_3 = arith.constant 0 : index
    %c0_4 = arith.constant 0 : index
    %3 = vector.load %arg3[%c0_3, %c0_4] : memref<1x128xf32, #tpu.memory_space<vmem>>, vector<1x128xf32>
    %4 = vector.broadcast %3 : vector<1x128xf32> to vector<16x128xf32>
    %5 = arith.addf %2, %4 : vector<16x128xf32>
    %c0_5 = arith.constant 0 : index
    %c0_6 = arith.constant 0 : index
    %6 = vector.load %arg4[%c0_5, %c0_6] : memref<16x128xf32, #tpu.memory_space<vmem>>, vector<16x128xf32>
    tpu.vector_store %arg4[%c0_5, %c0_6], %5 {strides = array<i32>} : memref<16x128xf32, #tpu.memory_space<vmem>>, vector<16x128xf32>,
    return
  }
  func.func @transform_0(%arg0: i32) -> (i32, i32) {
    %c0_i32 = arith.constant 0 : i32
    %c0_i32_0 = arith.constant 0 : i32
    return %arg0, %c0_i32 : i32, i32
  }
  func.func @transform_1(%arg0: i32) -> (i32, i32) {
    %c0_i32 = arith.constant 0 : i32
    %c0_i32_0 = arith.constant 0 : i32
    %c0_i32_1 = arith.constant 0 : i32
    return %c0_i32, %c0_i32_0 : i32, i32
  }
  func.func @transform_2(%arg0: i32) -> (i32, i32) {
    %c0_i32 = arith.constant 0 : i32
    %c0_i32_0 = arith.constant 0 : i32
    %c0_i32_1 = arith.constant 0 : i32
    return %c0_i32, %c0_i32_0 : i32, i32
  }
  func.func @transform_3(%arg0: i32) -> (i32, i32) {
    %c0_i32 = arith.constant 0 : i32
    %c0_i32_0 = arith.constant 0 : i32
    return %arg0, %c0_i32 : i32, i32
  }
}

</mosaic_0001>

<bundles_post_ra>
// kernel: _patch_embed_impl.1
= control target key start
LH: loop header
LB: loop body
LE: loop exit
PB: predicated region body
PF: predicated region fallthrough
CT: control target
= control target key end

     0   :  { %8 = vsyncpa [#allocation3], 0  ;;  %s630_s0 = inlined_call_operand.vmem [shape: bf16[32,64], index: 0, kind: input, shape index: {}]   ;;  %s631_s1 = inlined_call_operand.vmem [shape: bf16[64,128], index: 1, kind: input, shape index: {}]   ;;  %s632_s2 = inlined_call_operand.vmem [shape: f32[1,128], index: 2, kind: input, shape index: {}]   ;;  %s633_s3 = inlined_call_operand.hbm [shape: f32[32,128], index: 3, kind: output, shape index: {}]  }
   0x1   :  { %10 = vsyncpa [#allocation3 + $0x1], 0  ;;  %s514_s12 = smov 0   ;;  %s516_s13 = smov 0  }
   0x2   :  { %s518_s14 = smov 0   ;;  %s520_s15 = smov 0  }
   0x3 LB: > { %s535_s16 = sadd.s32 4294967295, %s487_s15   ;;  %s342_s17 = sadd.s32 4294967294, %s487_s15   ;;  %s487_s15 = sphi %s520_s15, %s639_s15   ;;  %s483_s14 = sphi %s518_s14, %s638_s14   ;;  %s479_s13 = sphi %s516_s13, %s637_s13   ;;  %s475_s12 = sphi %s514_s12, %s636_s12  }
   0x4   : > { %s539_s18 = sadd.s32 1, %s487_s15   ;;  %s91_s19 = sadd.s32 1, %s483_s14 }
   0x5   : > { %s88_s20 = ssub.s32 %s487_s15, %s539_s18  ;;  %p101_p0 = scmp.ne.s32.totalorder %s483_s14, %s479_s13 }
   0x6   : > { %p89_p1 = scmp.eq.s32.totalorder %s88_s20, 0  ;;  %p102_p2 = scmp.eq.s32.totalorder %s535_s16, 1 }
   0x7   : > { %p107_p3 = scmp.ne.s32.totalorder %s479_s13, %s475_s12  ;;  %p108_p4 = scmp.eq.s32.totalorder %s342_s17, 1 }
   0x8   : > { %s550_s21 = scalar_select %p89_p1, %s483_s14, %s91_s19  }
   0x9   : > { %p552_p5 = por %p102_p2, %p101_p0  ;;  %p556_p6 = por %p108_p4, %p107_p3 }
   0xa   : > { %p345_p7 = scmp.ge.s32.totalorder %s487_s15, 1  ;;  %p141_p8 = scmp.lt.s32.totalorder %s487_s15, 3 }
   0xc   : > { %p142_p9 = pnand %p345_p7, %p141_p8 }
   0xd   : > { %s347_s28 = sshll.u32 (!%p142_p9), %s535_s16, 1  ;;  %s162_s10 = sand.u32 (!%p142_p9), 1, %s479_s13  }
   0xe   : > { %145 = sbr.rel (%p142_p9) target bundleno = 249 (0xf9), region = 32  ;;  %p166_p10 = scmp.lt.s32.totalorder (!%p142_p9), %s347_s28, 3 }
   0xf   : > { %s346_s11 = sshll.u32 (!%p142_p9), %s162_s10, 4  ;;  %s361_s25 = sshll.u32 (!%p142_p9), %s535_s16, 8 }
  0x10   : > { %s164_s20 = scalar_lea.vmem (!%p142_p9), [#allocation2], %s346_s11  ;;  %s590_s29 = scalar_lea.sflag (!%p142_p9), [#allocation3], %s162_s10 }
  0x11   : > { %s280_s24 = sshll.u32 (!%p142_p9), %s164_s20, 4  ;;  %s491_s16 = smov (!%p142_p9), [#allocation2]   ;;  %s583_s24 = int_to_ptr.vmem [resolvable:$true] %s280_s24 }
  0x12   : > { %s427_s30 = scalar_lea.vmem (!%p142_p9), %s583_s24, 256 }
  0x13   : > { %v422_v0 = vld [vmem:[%s631_s1 + $0x18] sm:$0xff]   ;;  %v489_v1 = vmov 0.0   ;;  %v423_v2 = vld [vmem:[%s631_s1 + $0x10] sm:$0xff]   ;;  %vm490_vm0 = vmmov 0   ;;  %s641_s28 = smov (!%p166_p10, %s347_s28), 3  ;;  %v424_v3 = vld [vmem:[%s631_s1 + $0x8] sm:$0xff]   ;;  %p428_p11 = scmp.ne.s32.totalorder %s583_s24, %s427_s30 }
  0x14   : > { %367 = vmatprep.subr.bf16.mxu0 %v489_v1  ;;  %375 = vmatprep.mubr.msk.bf16.mxu0 %vm490_vm0, %v489_v1  ;;  %s348_s4 = sshll.u32 %s641_s28, 2  ;;  %v425_v4 = vld [vmem:[%s631_s1] sm:$0xff]   ;;  %vm219_vm1 = vcmask 523264   ;;  %s588_s28 = scalar_lea.hbm %s633_s3, %s361_s25 }
  0x15   : > { %368 = vmatpush3.bf16.msra.mxu0 %v422_v0  ;;  %s169_s7 = scalar_lea.vmem %s630_s0, %s348_s4  ;;  %v349_v6 = vld [vmem:[%s632_s2] ss:$0 sm:$0xff]  ;;  %p429_p12 = pnand %p428_p11, %p552_p5 }
  0x16   : > { %369 = vmatprep.subr.bf16.mxu0 %v489_v1  ;;  %v426_v5 = vld [vmem:[%s169_s7] sm:$0xff]   ;;  %s431_s4 = sshll.u32 %s491_s16, 4  ;;  %s432_s4 = int_to_ptr.vmem [resolvable:$false] %s431_s4 }
  0x17   : > { %p430_p13 = pneg %p429_p12  ;;  %s433_s5 = scalar_lea.vmem %s432_s4, 512 }
  0x18   : > { %p434_p0 = scmp.lt.s32.totalorder %s583_s24, %s432_s4  ;;  %p435_p1 = scmp.lt.s32.totalorder %s433_s5, %s427_s30 }
  0x19   : > { %370 = vmatpush3.bf16.msra.mxu0 %v423_v2 }
  0x1a   : > { %371 = vmatprep.subr.bf16.mxu0 %v489_v1  ;;  %p436_p2 = por %p435_p1, %p434_p0 }
  0x1c   : > { %p437_p3 = pnand %p436_p2, %p430_p13 }
  0x1d   : > { %372 = vmatpush3.bf16.msra.mxu0 %v424_v3 }
  0x1e   : > { %373 = vmatprep.subr.bf16.mxu0 %v489_v1 }
  0x21   : > { %374 = vmatpush3.bf16.msra.mxu0 %v425_v4 }
  0x24   : > { %376 = vmatmul.mubr.msk.bf16.vlgmr.msra.gmra.mxu0 %vm219_vm1, %v426_v5 }
  0xe4   : > { %v257_v7 = vpop.f32.mrf.mxu0 }
  0xe5   : > { %v258_v8 = vadd.f32 %v349_v6, %v257_v7 }
  0xe6   : > { %v377_v9 = vpop.f32.mrf.mxu0 }
  0xe7   : > { %264 = vst [vmem:[%s164_s20] sm:$0xff] %v258_v8 }
  0xe8   : > { %v260_v10 = vpop.f32.mrf.mxu0 }
  0xe9   : > { %v261_v11 = vadd.f32 %v349_v6, %v260_v10 }
  0xea   : > { %v378_v12 = vpop.f32.mrf.mxu0 }
  0xeb   : > { %265 = vst [vmem:[%s164_s20 + $0x8] sm:$0xff] %v261_v11 }
  0xec   : > { %440 = shalt.err (!%p437_p3)
}
  0xed   : > { %s441_s6 = scalar_lea.hbm %s588_s28, 256  ;;  %s445_s9 = scalar_lea.hbm %s633_s3, 512 }
  0xee   : > { %p442_p4 = scmp.ne.s32.totalorder %s588_s28, %s441_s6  ;;  %p446_p9 = scmp.lt.s32.totalorder %s588_s28, %s633_s3 }
  0xef   : > { %p447_p10 = scmp.lt.s32.totalorder %s445_s9, %s441_s6 }
  0xf0   : > { %p443_p7 = pnand %p442_p4, %p552_p5 }
  0xf1   : > { %p448_p11 = por %p447_p10, %p446_p9 }
  0xf2   : > { %p444_p8 = pneg %p443_p7 }
  0xf4   : > { %p449_p12 = pnand %p448_p11, %p444_p8 }
  0xf6   : > { %452 = shalt.err (!%p449_p12)
}
  0xf7   : > { %s492_s17 = smov 128   ;;  %s493_s19 = smov 8  }
  0xf8   : > { %379 = dma.vmem_to_hbm [thread:$0]  (%p552_p5), %s583_s24, 256, %s588_s28, %s590_s29, %s492_s17, %s492_s17, %s493_s19  }
  0xf9 PF: > { %p385_p13 = scmp.ge.s32.totalorder %s487_s15, 2  ;;  %s295_s20 = sand.u32 1, %s475_s12  }
  0xfa   : > { %s296_s25 = scalar_lea.sflag [#allocation3], %s295_s20 }
  0xfb   : > { %p382_p0 = pnand %p385_p13, %p556_p6 }
  0xfd   : > { %p383_p1 = pneg %p382_p0 }
  0xff   : > { %470 = dma.done.wait (%p383_p1), %s296_s25, 256  }
 0x100   : > { %472 = vsyncadd (%p383_p1), %s296_s25, 4294967040  ;;  %p13_p2 = scmp.ge.s32.totalorder %s539_s18, 4   ;;  %s636_s12 = smov %s479_s13 }
 0x101   : > { %s637_s13 = smov %s483_s14  ;;  %s638_s14 = smov %s550_s21 }
 0x102   : > { %s639_s15 = smov %s539_s18  ;;  %15 = sbr.rel (!%p13_p2) target bundleno = 3 (0x3), region = 67 }
 0x107   :  { %301 = vsyncpa [#allocation3], 1 }
 0x108   :  { %303 = vsyncpa [#allocation3 + $0x1], 1 }

// kernel: _patch_embed_impl.1
= control target key start
LH: loop header
LB: loop body
LE: loop exit
PB: predicated region body
PF: predicated region fallthrough
CT: control target
= control target key end

     0   :  { %8 = vsyncpa [#allocation3], 0  ;;  %s630_s0 = inlined_call_operand.vmem [shape: bf16[32,64], index: 0, kind: input, shape index: {}]   ;;  %s631_s1 = inlined_call_operand.vmem [shape: bf16[64,128], index: 1, kind: input, shape index: {}]   ;;  %s632_s2 = inlined_call_operand.vmem [shape: f32[1,128], index: 2, kind: input, shape index: {}]   ;;  %s633_s3 = inlined_call_operand.hbm [shape: f32[32,128], index: 3, kind: output, shape index: {}]  }
   0x1   :  { %10 = vsyncpa [#allocation3 + $0x1], 0  ;;  %s514_s12 = smov 0   ;;  %s516_s13 = smov 0  }
   0x2   :  { %s518_s14 = smov 0   ;;  %s520_s15 = smov 0  }
   0x3 LB: > { %s535_s16 = sadd.s32 4294967295, %s487_s15   ;;  %s342_s17 = sadd.s32 4294967294, %s487_s15   ;;  %s487_s15 = sphi %s520_s15, %s639_s15   ;;  %s483_s14 = sphi %s518_s14, %s638_s14   ;;  %s479_s13 = sphi %s516_s13, %s637_s13   ;;  %s475_s12 = sphi %s514_s12, %s636_s12  }
   0x4   : > { %s539_s18 = sadd.s32 1, %s487_s15   ;;  %s91_s19 = sadd.s32 1, %s483_s14 }
   0x5   : > { %s88_s20 = ssub.s32 %s487_s15, %s539_s18  ;;  %p101_p0 = scmp.ne.s32.totalorder %s483_s14, %s479_s13 }
   0x6   : > { %p89_p1 = scmp.eq.s32.totalorder %s88_s20, 0  ;;  %p102_p2 = scmp.eq.s32.totalorder %s535_s16, 1 }
   0x7   : > { %p107_p3 = scmp.ne.s32.totalorder %s479_s13, %s475_s12  ;;  %p108_p4 = scmp.eq.s32.totalorder %s342_s17, 1 }
   0x8   : > { %s550_s21 = scalar_select %p89_p1, %s483_s14, %s91_s19  }
   0x9   : > { %p552_p5 = por %p102_p2, %p101_p0  ;;  %p556_p6 = por %p108_p4, %p107_p3 }
   0xa   : > { %p345_p7 = scmp.ge.s32.totalorder %s487_s15, 1  ;;  %p141_p8 = scmp.lt.s32.totalorder %s487_s15, 3 }
   0xc   : > { %p142_p9 = pnand %p345_p7, %p141_p8 }
   0xd   : > { %s347_s28 = sshll.u32 (!%p142_p9), %s535_s16, 1  ;;  %s162_s10 = sand.u32 (!%p142_p9), 1, %s479_s13  }
   0xe   : > { %145 = sbr.rel (%p142_p9) target bundleno = 249 (0xf9), region = 32  ;;  %p166_p10 = scmp.lt.s32.totalorder (!%p142_p9), %s347_s28, 3 }
   0xf   : > { %s346_s11 = sshll.u32 (!%p142_p9), %s162_s10, 4  ;;  %s361_s25 = sshll.u32 (!%p142_p9), %s535_s16, 8 }
  0x10   : > { %s164_s20 = scalar_lea.vmem (!%p142_p9), [#allocation2], %s346_s11  ;;  %s590_s29 = scalar_lea.sflag (!%p142_p9), [#allocation3], %s162_s10 }
  0x11   : > { %s280_s24 = sshll.u32 (!%p142_p9), %s164_s20, 4  ;;  %s491_s16 = smov (!%p142_p9), [#allocation2]   ;;  %s583_s24 = int_to_ptr.vmem [resolvable:$true] %s280_s24 }
  0x12   : > { %s427_s30 = scalar_lea.vmem (!%p142_p9), %s583_s24, 256 }
  0x13   : > { %v422_v0 = vld [vmem:[%s631_s1 + $0x18] sm:$0xff]   ;;  %v489_v1 = vmov 0.0   ;;  %v423_v2 = vld [vmem:[%s631_s1 + $0x10] sm:$0xff]   ;;  %vm490_vm0 = vmmov 0   ;;  %s641_s28 = smov (!%p166_p10, %s347_s28), 3  ;;  %v424_v3 = vld [vmem:[%s631_s1 + $0x8] sm:$0xff]   ;;  %p428_p11 = scmp.ne.s32.totalorder %s583_s24, %s427_s30 }
  0x14   : > { %367 = vmatprep.subr.bf16.mxu0 %v489_v1  ;;  %375 = vmatprep.mubr.msk.bf16.mxu0 %vm490_vm0, %v489_v1  ;;  %s348_s4 = sshll.u32 %s641_s28, 2  ;;  %v425_v4 = vld [vmem:[%s631_s1] sm:$0xff]   ;;  %vm219_vm1 = vcmask 523264   ;;  %s588_s28 = scalar_lea.hbm %s633_s3, %s361_s25 }
  0x15   : > { %368 = vmatpush3.bf16.msra.mxu0 %v422_v0  ;;  %s169_s7 = scalar_lea.vmem %s630_s0, %s348_s4  ;;  %v349_v6 = vld [vmem:[%s632_s2] ss:$0 sm:$0xff]  ;;  %p429_p12 = pnand %p428_p11, %p552_p5 }
  0x16   : > { %369 = vmatprep.subr.bf16.mxu0 %v489_v1  ;;  %v426_v5 = vld [vmem:[%s169_s7] sm:$0xff]   ;;  %s431_s4 = sshll.u32 %s491_s16, 4  ;;  %s432_s4 = int_to_ptr.vmem [resolvable:$false] %s431_s4 }
  0x17   : > { %p430_p13 = pneg %p429_p12  ;;  %s433_s5 = scalar_lea.vmem %s432_s4, 512 }
  0x18   : > { %p434_p0 = scmp.lt.s32.totalorder %s583_s24, %s432_s4  ;;  %p435_p1 = scmp.lt.s32.totalorder %s433_s5, %s427_s30 }
  0x19   : > { %370 = vmatpush3.bf16.msra.mxu0 %v423_v2 }
  0x1a   : > { %371 = vmatprep.subr.bf16.mxu0 %v489_v1  ;;  %p436_p2 = por %p435_p1, %p434_p0 }
  0x1c   : > { %p437_p3 = pnand %p436_p2, %p430_p13 }
  0x1d   : > { %372 = vmatpush3.bf16.msra.mxu0 %v424_v3 }
  0x1e   : > { %373 = vmatprep.subr.bf16.mxu0 %v489_v1 }
  0x21   : > { %374 = vmatpush3.bf16.msra.mxu0 %v425_v4 }
  0x24   : > { %376 = vmatmul.mubr.msk.bf16.vlgmr.msra.gmra.mxu0 %vm219_vm1, %v426_v5 }
  0xe4   : > { %v257_v7 = vpop.f32.mrf.mxu0 }
  0xe5   : > { %v258_v8 = vadd.f32 %v349_v6, %v257_v7 }
  0xe6   : > { %v377_v9 = vpop.f32.mrf.mxu0 }
  0xe7   : > { %264 = vst [vmem:[%s164_s20] sm:$0xff] %v258_v8 }
  0xe8   : > { %v260_v10 = vpop.f32.mrf.mxu0 }
  0xe9   : > { %v261_v11 = vadd.f32 %v349_v6, %v260_v10 }
  0xea   : > { %v378_v12 = vpop.f32.mrf.mxu0 }
  0xeb   : > { %265 = vst [vmem:[%s164_s20 + $0x8] sm:$0xff] %v261_v11 }
  0xec   : > { %440 = shalt.err (!%p437_p3)
}
  0xed   : > { %s441_s6 = scalar_lea.hbm %s588_s28, 256  ;;  %s445_s9 = scalar_lea.hbm %s633_s3, 512 }
  0xee   : > { %p442_p4 = scmp.ne.s32.totalorder %s588_s28, %s441_s6  ;;  %p446_p9 = scmp.lt.s32.totalorder %s588_s28, %s633_s3 }
  0xef   : > { %p447_p10 = scmp.lt.s32.totalorder %s445_s9, %s441_s6 }
  0xf0   : > { %p443_p7 = pnand %p442_p4, %p552_p5 }
  0xf1   : > { %p448_p11 = por %p447_p10, %p446_p9 }
  0xf2   : > { %p444_p8 = pneg %p443_p7 }
  0xf4   : > { %p449_p12 = pnand %p448_p11, %p444_p8 }
  0xf6   : > { %452 = shalt.err (!%p449_p12)
}
  0xf7   : > { %s492_s17 = smov 128   ;;  %s493_s19 = smov 8  }
  0xf8   : > { %379 = dma.vmem_to_hbm [thread:$0]  (%p552_p5), %s583_s24, 256, %s588_s28, %s590_s29, %s492_s17, %s492_s17, %s493_s19  }
  0xf9 PF: > { %p385_p13 = scmp.ge.s32.totalorder %s487_s15, 2  ;;  %s295_s20 = sand.u32 1, %s475_s12  }
  0xfa   : > { %s296_s25 = scalar_lea.sflag [#allocation3], %s295_s20 }
  0xfb   : > { %p382_p0 = pnand %p385_p13, %p556_p6 }
  0xfd   : > { %p383_p1 = pneg %p382_p0 }
  0xff   : > { %470 = dma.done.wait (%p383_p1), %s296_s25, 256  }
 0x100   : > { %472 = vsyncadd (%p383_p1), %s296_s25, 4294967040  ;;  %p13_p2 = scmp.ge.s32.totalorder %s539_s18, 4   ;;  %s636_s12 = smov %s479_s13 }
 0x101   : > { %s637_s13 = smov %s483_s14  ;;  %s638_s14 = smov %s550_s21 }
 0x102   : > { %s639_s15 = smov %s539_s18  ;;  %15 = sbr.rel (!%p13_p2) target bundleno = 3 (0x3), region = 67 }
 0x107   :  { %301 = vsyncpa [#allocation3], 1 }
 0x108   :  { %303 = vsyncpa [#allocation3 + $0x1], 1 }

</bundles_post_ra>
